<compile_context>
chip_gen: v5e
topology: v5e:2x2
jax: 0.10.0
libtpu: 0.0.40
codegen_flags: <defaults>
</compile_context>

<pallas_src>
import math

import jax
import jax.numpy as jnp
from jax.experimental import pallas as pl
from jax.experimental.pallas import tpu as pltpu


# ----------------------------------------------------------------------------
# Buffer setup (glue, mirrors PositionalEncoding1D.make_pe)
# ----------------------------------------------------------------------------
def make_pe(d_model: int, max_len: int, dtype=jnp.float32) -> jnp.ndarray:
    """Returns (max_len, 1, d_model), matching torch's registered buffer."""
    assert d_model % 2 == 0, "d_model must be even (same implicit requirement as the torch code)"
    position = jnp.arange(max_len, dtype=jnp.float32)[:, None]                 # (L, 1)
    div_term = jnp.exp(
        jnp.arange(0, d_model, 2, dtype=jnp.float32) * (-math.log(10000.0) / d_model)
    )                                                                          # (d_model/2,)
    pe = jnp.zeros((max_len, d_model), dtype=jnp.float32)
    pe = pe.at[:, 0::2].set(jnp.sin(position * div_term))
    pe = pe.at[:, 1::2].set(jnp.cos(position * div_term))
    return pe[:, None, :].astype(dtype)                                        # (L, 1, d_model)


# ----------------------------------------------------------------------------
# Pallas kernel: x_tile + pe_tile (pe broadcast over the batch axis)
# ----------------------------------------------------------------------------
def _add_pe_kernel(x_ref, pe_ref, o_ref):
    # x_ref: (ts, B, D), pe_ref: (ts, 1, D) -> broadcast over B on sublanes.
    # Compute in f32 (exact no-op for f32 I/O; correct/cheap for bf16 I/O).
    x = x_ref[...].astype(jnp.float32)
    pe = pe_ref[...].astype(jnp.float32)
    o_ref[...] = (x + pe).astype(o_ref.dtype)


def positional_encoding_1d(x: jnp.ndarray, pe_full: jnp.ndarray,
                           *, vmem_budget_bytes: int = 8 * 1024 * 1024) -> jnp.ndarray:
    """x: (S, B, d_model); pe_full: (max_len, 1, d_model). Returns x + pe[:S]."""
    S, B, D = x.shape
    L, one, Dp = pe_full.shape
    assert one == 1 and Dp == D, "pe buffer shape mismatch"
    assert S <= L, "sequence length exceeds max_len of the pe buffer"
    pe_full = pe_full.astype(x.dtype)  # no-op when dtypes already match

    itemsize = jnp.dtype(x.dtype).itemsize
    # Per grid step VMEM: 2*(x block) + 2*(out block) + 2*(pe block).
    per_row_bytes = (4 * B * D + 2 * D) * itemsize
    ts = max(1, min(S, vmem_budget_bytes // per_row_bytes))
    if ts >= 8:
        ts -= ts % 8  # keep the leading tile dim sublane-friendly when possible
    grid = (pl.cdiv(S, ts),)

    cost = pl.CostEstimate(
        flops=S * B * D,
        transcendentals=0,
        bytes_accessed=(2 * S * B * D + S * D) * itemsize,
    )

    return pl.pallas_call(
        _add_pe_kernel,
        out_shape=jax.ShapeDtypeStruct((S, B, D), x.dtype),
        grid_spec=pltpu.PrefetchScalarGridSpec(
            num_scalar_prefetch=0,
            grid=grid,
            in_specs=[
                # x: one S-tile per grid step, full (B, D) payload (lane axis = D)
                pl.BlockSpec((ts, B, D), lambda i: (i, 0, 0)),
                # pe: windowed directly out of the full (max_len, 1, D) buffer,
                # no per-call slice; batch broadcast happens in the kernel.
                pl.BlockSpec((ts, 1, D), lambda i: (i, 0, 0)),
            ],
            out_specs=pl.BlockSpec((ts, B, D), lambda i: (i, 0, 0)),
        ),
        compiler_params=pltpu.CompilerParams(
            dimension_semantics=("parallel",),
            vmem_limit_bytes=48 * 1024 * 1024,  # explicit; well above the ~8 MiB footprint
        ),
        input_output_aliases={0: 0},  # in-place add when the caller donates x
        cost_estimate=cost,
    )(x, pe_full)


# ----------------------------------------------------------------------------
# Demo / correctness check
# ----------------------------------------------------------------------------
if __name__ == "__main__":
    S, B, d_model = 16, 2, 128
    max_len = 100

    key = jax.random.PRNGKey(0)
    x = jax.random.normal(key, (S, B, d_model), dtype=jnp.float32)

    pe_full = make_pe(d_model, max_len, dtype=x.dtype)

    # pure-JAX reference of the forward pass (dropout is identity in eval mode)
    ref = x + pe_full[:S]

    out = jax.jit(positional_encoding_1d)(x, pe_full)
    out = jax.block_until_ready(out)

    assert out.shape == x.shape
    assert jnp.allclose(out, ref, atol=1e-6, rtol=1e-6), "mismatch vs reference"

    print("KERNEL_OK")
</pallas_src>

<mosaic_0001>
module attributes {stable_mosaic.version = 11 : i64} {
  func.func @_add_pe_kernel(%arg0: i32, %arg1: memref<16x2x128xf32, #tpu.memory_space<vmem>>, %arg2: memref<16x1x128xf32, #tpu.memory_space<vmem>>, %arg3: memref<16x2x128xf32, #tpu.memory_space<vmem>>) attributes {dimension_semantics = [#tpu.dimension_semantics<parallel>], iteration_bounds = array<i64: 1>, scalar_prefetch = 0 : i64, scratch_operands = 0 : i64, tpu.core_type = #tpu.core_type<tc>, window_params = [{transform_indices = @transform_0, window_bounds = array<i64: 16, 2, 128>}, {transform_indices = @transform_1, window_bounds = array<i64: 16, 1, 128>}, {transform_indices = @transform_2, window_bounds = array<i64: 16, 2, 128>}]} {
    %c0 = arith.constant 0 : index
    %c0_0 = arith.constant 0 : index
    %c0_1 = arith.constant 0 : index
    %0 = vector.load %arg1[%c0, %c0_0, %c0_1] : memref<16x2x128xf32, #tpu.memory_space<vmem>>, vector<16x2x128xf32>
    %c0_2 = arith.constant 0 : index
    %c0_3 = arith.constant 0 : index
    %c0_4 = arith.constant 0 : index
    %1 = vector.load %arg2[%c0_2, %c0_3, %c0_4] : memref<16x1x128xf32, #tpu.memory_space<vmem>>, vector<16x1x128xf32>
    %2 = vector.broadcast %1 : vector<16x1x128xf32> to vector<16x2x128xf32>
    %3 = arith.addf %0, %2 : vector<16x2x128xf32>
    %c0_5 = arith.constant 0 : index
    %c0_6 = arith.constant 0 : index
    %c0_7 = arith.constant 0 : index
    %4 = vector.load %arg3[%c0_5, %c0_6, %c0_7] : memref<16x2x128xf32, #tpu.memory_space<vmem>>, vector<16x2x128xf32>
    tpu.vector_store %arg3[%c0_5, %c0_6, %c0_7], %3 {strides = array<i32>} : memref<16x2x128xf32, #tpu.memory_space<vmem>>, vector<16x2x128xf32>,
    return
  }
  func.func @transform_0(%arg0: i32) -> (i32, i32, i32) {
    %c0_i32 = arith.constant 0 : i32
    %c0_i32_0 = arith.constant 0 : i32
    %c0_i32_1 = arith.constant 0 : i32
    return %arg0, %c0_i32, %c0_i32_0 : i32, i32, i32
  }
  func.func @transform_1(%arg0: i32) -> (i32, i32, i32) {
    %c0_i32 = arith.constant 0 : i32
    %c0_i32_0 = arith.constant 0 : i32
    %c0_i32_1 = arith.constant 0 : i32
    return %arg0, %c0_i32, %c0_i32_0 : i32, i32, i32
  }
  func.func @transform_2(%arg0: i32) -> (i32, i32, i32) {
    %c0_i32 = arith.constant 0 : i32
    %c0_i32_0 = arith.constant 0 : i32
    %c0_i32_1 = arith.constant 0 : i32
    return %arg0, %c0_i32, %c0_i32_0 : i32, i32, i32
  }
}

</mosaic_0001>

<bundles_post_ra>
// kernel: positional_encoding_1d.1
= control target key start
LH: loop header
LB: loop body
LE: loop exit
PB: predicated region body
PF: predicated region fallthrough
CT: control target
= control target key end

     0   :  { %7 = vsyncpa [#allocation3], 0  ;;  %s321_s0 = inlined_call_operand.hbm [shape: f32[16,2,128], index: 0, kind: input, shape index: {}, may-alias: {0,2}]   ;;  %s322_s1 = inlined_call_operand.hbm [shape: f32[100,1,128], index: 1, kind: input, shape index: {}]   ;;  %s323_s2 = inlined_call_operand.hbm [shape: f32[16,2,128], index: 2, kind: output, shape index: {}, may-alias: {0,2}]  }
   0x1   :  { %8 = vsyncpa [#allocation6], 0 }
   0x2   :  { %9 = vsyncpa [#allocation4], 0  ;;  %s14_s11 = sshll.u32 %s321_s0, 4  ;;  %s277_s12 = smov [#allocation2]   ;;  %s15_s11 = int_to_ptr.hbm [resolvable:$true] %s14_s11 }
   0x3   :  { %s16_s13 = sshll.u32 %s277_s12, 4  ;;  %s27_s16 = sshll.u32 %s322_s1, 4  ;;  %s17_s13 = int_to_ptr.vmem [resolvable:$true] %s16_s13  ;;  %s28_s16 = int_to_ptr.hbm [resolvable:$true] %s27_s16 }
   0x4   :  { %s278_s17 = smov 32   ;;  %s279_s18 = smov 2  }
   0x5   :  { %22 = dma.hbm_to_vmem [thread:$0]  %s15_s11, 512, %s17_s13, [#allocation3], %s278_s17, %s278_s17, %s279_s18  }
   0x6   :  { %s280_s19 = smov [#allocation5]   ;;  %s281_s21 = smov 16  }
   0x7   :  { %s29_s20 = sshll.u32 %s280_s19, 4  ;;  %s282_s0 = smov 1   ;;  %s30_s20 = int_to_ptr.vmem [resolvable:$true] %s29_s20 }
   0x8   :  { %35 = dma.hbm_to_vmem [thread:$0]  %s28_s16, 256, %s30_s20, [#allocation6], %s281_s21, %s281_s21, %s282_s0  }
   0x9   :  { %271 = dma.done.wait [#allocation3], 512  }
   0xa   :  { %272 = vsyncadd [#allocation3], 4294966784 }
   0xb   :  { %273 = dma.done.wait [#allocation6], 256  }
   0xc   :  { %274 = vsyncadd [#allocation6], 4294967040  ;;  %s283_s22 = smov [#allocation7]   ;;  %s162_s25 = sshll.u32 %s323_s2, 4  ;;  %v44_v0 = vld [vmem:[#allocation2] sm:$0x3]  ;;  %s163_s25 = int_to_ptr.hbm [resolvable:$true] %s162_s25 }
   0xd   :  { %s308_s23 = sshll.u32 %s283_s22, 4  ;;  %v183_v1 = vld [vmem:[#allocation5] ss:$0 sm:$0xff]  ;;  %v45_v2 = vld [vmem:[#allocation2 + $0x2] sm:$0x3]  ;;  %s161_s23 = int_to_ptr.vmem [resolvable:$true] %s308_s23 }
   0xe   :  { %v184_v3 = vld [vmem:[#allocation5 + $0x1] ss:$0 sm:$0xff]  ;;  %v124_v4 = vadd.f32 %v183_v1, %v44_v0  ;;  %v46_v5 = vld [vmem:[#allocation2 + $0x4] sm:$0x3]  ;;  %v185_v6 = vld [vmem:[#allocation5 + $0x2] ss:$0 sm:$0xff] }
   0xf   :  { %v125_v7 = vadd.f32 %v184_v3, %v45_v2  ;;  %v47_v8 = vld [vmem:[#allocation2 + $0x6] sm:$0x3]  ;;  %v186_v9 = vld [vmem:[#allocation5 + $0x3] ss:$0 sm:$0xff]  ;;  %v126_v10 = vadd.f32 %v185_v6, %v46_v5  ;;  %v48_v11 = vld [vmem:[#allocation2 + $0x8] sm:$0x3] }
  0x10   :  { %140 = vst [vmem:[#allocation7] sm:$0x3] %v124_v4  ;;  %v127_v12 = vadd.f32 %v186_v9, %v47_v8  ;;  %v187_v13 = vld [vmem:[#allocation5 + $0x4] ss:$0 sm:$0xff]  ;;  %v49_v14 = vld [vmem:[#allocation2 + $0xa] sm:$0x3] }
  0x11   :  { %141 = vst [vmem:[#allocation7 + $0x2] sm:$0x3] %v125_v7  ;;  %v188_v15 = vld [vmem:[#allocation5 + $0x5] ss:$0 sm:$0xff]  ;;  %v128_v16 = vadd.f32 %v187_v13, %v48_v11  ;;  %v50_v17 = vld [vmem:[#allocation2 + $0xc] sm:$0x3] }
  0x12   :  { %142 = vst [vmem:[#allocation7 + $0x4] sm:$0x3] %v126_v10  ;;  %v129_v18 = vadd.f32 %v188_v15, %v49_v14  ;;  %v189_v19 = vld [vmem:[#allocation5 + $0x6] ss:$0 sm:$0xff]  ;;  %v51_v20 = vld [vmem:[#allocation2 + $0xe] sm:$0x3] }
  0x13   :  { %143 = vst [vmem:[#allocation7 + $0x6] sm:$0x3] %v127_v12  ;;  %v190_v21 = vld [vmem:[#allocation5 + $0x7] ss:$0 sm:$0xff]  ;;  %v52_v22 = vld [vmem:[#allocation2 + $0x10] sm:$0x3]  ;;  %v130_v23 = vadd.f32 %v189_v19, %v50_v17 }
  0x14   :  { %144 = vst [vmem:[#allocation7 + $0x8] sm:$0x3] %v128_v16  ;;  %v191_v24 = vld [vmem:[#allocation5 + $0x8] ss:$0 sm:$0xff]  ;;  %v131_v25 = vadd.f32 %v190_v21, %v51_v20  ;;  %v53_v26 = vld [vmem:[#allocation2 + $0x12] sm:$0x3] }
  0x15   :  { %145 = vst [vmem:[#allocation7 + $0xa] sm:$0x3] %v129_v18  ;;  %v192_v27 = vld [vmem:[#allocation5 + $0x9] ss:$0 sm:$0xff]  ;;  %v132_v28 = vadd.f32 %v191_v24, %v52_v22  ;;  %v54_v29 = vld [vmem:[#allocation2 + $0x14] sm:$0x3] }
  0x16   :  { %146 = vst [vmem:[#allocation7 + $0xc] sm:$0x3] %v130_v23  ;;  %v133_v30 = vadd.f32 %v192_v27, %v53_v26  ;;  %v193_v31 = vld [vmem:[#allocation5 + $0xa] ss:$0 sm:$0xff]  ;;  %v55_v32 = vld [vmem:[#allocation2 + $0x16] sm:$0x3] }
  0x17   :  { %147 = vst [vmem:[#allocation7 + $0xe] sm:$0x3] %v131_v25  ;;  %v194_v33 = vld [vmem:[#allocation5 + $0xb] ss:$0 sm:$0xff]  ;;  %v134_v34 = vadd.f32 %v193_v31, %v54_v29  ;;  %v56_v35 = vld [vmem:[#allocation2 + $0x18] sm:$0x3] }
  0x18   :  { %148 = vst [vmem:[#allocation7 + $0x10] sm:$0x3] %v132_v28  ;;  %v135_v36 = vadd.f32 %v194_v33, %v55_v32  ;;  %v195_v37 = vld [vmem:[#allocation5 + $0xc] ss:$0 sm:$0xff]  ;;  %v57_v38 = vld [vmem:[#allocation2 + $0x1a] sm:$0x3] }
  0x19   :  { %149 = vst [vmem:[#allocation7 + $0x12] sm:$0x3] %v133_v30  ;;  %v196_v39 = vld [vmem:[#allocation5 + $0xd] ss:$0 sm:$0xff]  ;;  %v58_v40 = vld [vmem:[#allocation2 + $0x1c] sm:$0x3]  ;;  %v136_v41 = vadd.f32 %v195_v37, %v56_v35 }
  0x1a   :  { %150 = vst [vmem:[#allocation7 + $0x14] sm:$0x3] %v134_v34  ;;  %v197_v42 = vld [vmem:[#allocation5 + $0xe] ss:$0 sm:$0xff]  ;;  %v137_v43 = vadd.f32 %v196_v39, %v57_v38  ;;  %v59_v44 = vld [vmem:[#allocation2 + $0x1e] sm:$0x3] }
  0x1b   :  { %151 = vst [vmem:[#allocation7 + $0x16] sm:$0x3] %v135_v36  ;;  %v198_v45 = vld [vmem:[#allocation5 + $0xf] ss:$0 sm:$0xff]  ;;  %v138_v46 = vadd.f32 %v197_v42, %v58_v40 }
  0x1c   :  { %152 = vst [vmem:[#allocation7 + $0x18] sm:$0x3] %v136_v41  ;;  %v139_v47 = vadd.f32 %v198_v45, %v59_v44 }
  0x1d   :  { %153 = vst [vmem:[#allocation7 + $0x1a] sm:$0x3] %v137_v43 }
  0x1e   :  { %154 = vst [vmem:[#allocation7 + $0x1c] sm:$0x3] %v138_v46 }
  0x1f   :  { %155 = vst [vmem:[#allocation7 + $0x1e] sm:$0x3] %v139_v47 }
  0x20   :  { %168 = dma.vmem_to_hbm [thread:$0]  %s161_s23, 512, %s163_s25, [#allocation4], %s278_s17, %s278_s17, %s279_s18  }
  0x21   :  { %275 = dma.done.wait [#allocation4], 512  }
  0x22   :  { %276 = vsyncadd [#allocation4], 4294966784 }
  0x23   :  { %173 = vsyncpa [#allocation3], 1 }
  0x24   :  { %174 = vsyncpa [#allocation6], 1 }
  0x25   :  { %175 = vsyncpa [#allocation4], 1 }

</bundles_post_ra>
